<compile_context>
chip_gen: v7x
topology: tpu7x:2x2x1
jax: 0.10.0
libtpu: 0.0.40
codegen_flags: <defaults>
</compile_context>

<pallas_src>
import jax
import jax.numpy as jnp
from jax.experimental import pallas as pl
from jax.experimental.pallas import tpu as pltpu


def rnn_kernel(x_ref, wih_t_ref, whh_t_ref, bias_ref, out_ref):
    """Elman RNN (tanh) forward, batch=1 (batch dim squeezed).

    x_ref:     (seq, input)     f32
    wih_t_ref: (input, hidden)  f32   (W_ih transposed)
    whh_t_ref: (hidden, hidden) f32   (W_hh transposed)
    bias_ref:  (1, hidden)      f32   (b_ih + b_hh)
    out_ref:   (seq, hidden)    f32
    """
    seq, hidden = out_ref.shape

    # Hoisted input projection: no serial dependency, so one matmul + one
    # bias broadcast for all timesteps, outside the recurrence.
    pre_x = (
        jnp.dot(x_ref[...], wih_t_ref[...], preferred_element_type=jnp.float32)
        + bias_ref[...]
    )

    whh_t = whh_t_ref[...]

    # h_0 = zeros (matches `hidden = torch.zeros(...)` in the module).
    h = jnp.zeros((1, hidden), jnp.float32)

    # Fully unrolled recurrence; h stays in vregs (loop-carried value).
    hs = []
    for t in range(seq):
        pre = (
            jnp.dot(h, whh_t, preferred_element_type=jnp.float32)
            + pre_x[t:t + 1, :]
        )
        h = jnp.tanh(pre)
        hs.append(h)

    # Single lane/sublane-dense store of all timesteps at once.
    out_ref[...] = jnp.concatenate(hs, axis=0).astype(out_ref.dtype)


def rnn_forward(x, w_ih, w_hh, b_ih, b_hh):
    """x: (seq, batch, input). Returns (seq*batch, hidden)."""
    seq, batch, input_size = x.shape
    assert batch == 1, "kernel specialized for the module's batch_size=1"
    hidden = w_ih.shape[0]

    x2d = x.reshape(seq, input_size)               # squeeze batch=1
    wih_t = jnp.transpose(w_ih)                    # (input, hidden)
    whh_t = jnp.transpose(w_hh)                    # (hidden, hidden)
    bias = (b_ih + b_hh).reshape(1, hidden)        # (1, hidden)

    vmem = pl.BlockSpec(memory_space=pltpu.MemorySpace.VMEM)

    # No grid: total footprint is a few hundred bytes; per-grid-step overhead
    # would dwarf the kernel. All arrays live in VMEM for the whole call.
    # TODO(synk): at large hidden/batch/seq, tile x/out over seq with a grid
    # and keep weights pinned (index_map -> (0,0)) to fit v7x's 64 MiB VMEM.
    out = pl.pallas_call(
        rnn_kernel,
        out_shape=jax.ShapeDtypeStruct((seq, hidden), jnp.float32),
        in_specs=[vmem, vmem, vmem, vmem],
        out_specs=vmem,
    )(x2d, wih_t, whh_t, bias)

    return out.reshape(-1, hidden)


def reference_rnn(x, w_ih, w_hh, b_ih, b_hh):
    """Pure-JAX reference of torch.nn.RNN (tanh) forward."""
    seq, batch, _ = x.shape
    hidden = w_ih.shape[0]
    h = jnp.zeros((batch, hidden), jnp.float32)
    outs = []
    for t in range(seq):
        h = jnp.tanh(x[t] @ w_ih.T + b_ih + h @ w_hh.T + b_hh)
        outs.append(h)
    return jnp.stack(outs).reshape(-1, hidden)


if __name__ == "__main__":
    # Module hyperparameters (from the PyTorch script).
    batch_size = 1
    hidden_size = 4
    input_size = 4
    num_layers = 1  # single layer only
    seq_len = 8

    key = jax.random.PRNGKey(0)
    kx, k1, k2, k3, k4 = jax.random.split(key, 5)

    # Deterministic parameter init, uniform(-1/sqrt(H), 1/sqrt(H)) like PyTorch.
    bound = 1.0 / (hidden_size ** 0.5)
    w_ih = jax.random.uniform(k1, (hidden_size, input_size), jnp.float32, -bound, bound)
    w_hh = jax.random.uniform(k2, (hidden_size, hidden_size), jnp.float32, -bound, bound)
    b_ih = jax.random.uniform(k3, (hidden_size,), jnp.float32, -bound, bound)
    b_hh = jax.random.uniform(k4, (hidden_size,), jnp.float32, -bound, bound)

    # Input: (seq_len, batch, input_size), seq-major like nn.RNN default.
    x = jax.random.normal(kx, (seq_len, batch_size, input_size), jnp.float32)

    out = rnn_forward(x, w_ih, w_hh, b_ih, b_hh)
    out = jax.block_until_ready(out)

    ref = reference_rnn(x, w_ih, w_hh, b_ih, b_hh)
    assert out.shape == (seq_len * batch_size, hidden_size), out.shape
    assert jnp.allclose(out, ref, atol=1e-5, rtol=1e-5), "mismatch vs reference"

    print("KERNEL_OK")
</pallas_src>

<mosaic_0001>
module attributes {stable_mosaic.version = 11 : i64} {
  func.func @rnn_kernel(%arg0: memref<8x4xf32, #tpu.memory_space<vmem>>, %arg1: memref<4x4xf32, #tpu.memory_space<vmem>>, %arg2: memref<4x4xf32, #tpu.memory_space<vmem>>, %arg3: memref<1x4xf32, #tpu.memory_space<vmem>>, %arg4: memref<8x4xf32, #tpu.memory_space<vmem>>) attributes {dimension_semantics = [], scalar_prefetch = 0 : i64, scratch_operands = 0 : i64, tpu.core_type = #tpu.core_type<tc>} {
    %c0 = arith.constant 0 : index
    %c0_0 = arith.constant 0 : index
    %0 = vector.load %arg0[%c0, %c0_0] : memref<8x4xf32, #tpu.memory_space<vmem>>, vector<8x4xf32>
    %c0_1 = arith.constant 0 : index
    %c0_2 = arith.constant 0 : index
    %1 = vector.load %arg1[%c0_1, %c0_2] : memref<4x4xf32, #tpu.memory_space<vmem>>, vector<4x4xf32>
    %cst = arith.constant dense<0.000000e+00> : vector<8x4xf32>
    %2 = tpu.matmul %0, %1, %cst {dimension_numbers = #tpu.dot_dimension_numbers<[1], [0], [0], [1], [0, 0, 1, 1], [], []>} : vector<8x4xf32>, vector<4x4xf32>, vector<8x4xf32> -> vector<8x4xf32>
    %c0_3 = arith.constant 0 : index
    %c0_4 = arith.constant 0 : index
    %3 = vector.load %arg3[%c0_3, %c0_4] : memref<1x4xf32, #tpu.memory_space<vmem>>, vector<1x4xf32>
    %4 = vector.broadcast %3 : vector<1x4xf32> to vector<8x4xf32>
    %5 = arith.addf %2, %4 : vector<8x4xf32>
    %c0_5 = arith.constant 0 : index
    %c0_6 = arith.constant 0 : index
    %6 = vector.load %arg2[%c0_5, %c0_6] : memref<4x4xf32, #tpu.memory_space<vmem>>, vector<4x4xf32>
    %cst_7 = arith.constant 0.000000e+00 : f32
    %7 = vector.broadcast %cst_7 : f32 to vector<1x4xf32>
    %cst_8 = arith.constant dense<0.000000e+00> : vector<1x4xf32>
    %8 = tpu.matmul %7, %6, %cst_8 {dimension_numbers = #tpu.dot_dimension_numbers<[1], [0], [0], [1], [0, 0, 1, 1], [], []>} : vector<1x4xf32>, vector<4x4xf32>, vector<1x4xf32> -> vector<1x4xf32>
    %9 = vector.extract_strided_slice %5 {offsets = [0, 0], sizes = [1, 4], strides = [1, 1]} : vector<8x4xf32> to vector<1x4xf32>
    %10 = arith.addf %8, %9 : vector<1x4xf32>
    %11 = math.tanh %10 : vector<1x4xf32>
    %cst_9 = arith.constant dense<0.000000e+00> : vector<1x4xf32>
    %12 = tpu.matmul %11, %6, %cst_9 {dimension_numbers = #tpu.dot_dimension_numbers<[1], [0], [0], [1], [0, 0, 1, 1], [], []>} : vector<1x4xf32>, vector<4x4xf32>, vector<1x4xf32> -> vector<1x4xf32>
    %13 = vector.extract_strided_slice %5 {offsets = [1, 0], sizes = [1, 4], strides = [1, 1]} : vector<8x4xf32> to vector<1x4xf32>
    %14 = arith.addf %12, %13 : vector<1x4xf32>
    %15 = math.tanh %14 : vector<1x4xf32>
    %cst_10 = arith.constant dense<0.000000e+00> : vector<1x4xf32>
    %16 = tpu.matmul %15, %6, %cst_10 {dimension_numbers = #tpu.dot_dimension_numbers<[1], [0], [0], [1], [0, 0, 1, 1], [], []>} : vector<1x4xf32>, vector<4x4xf32>, vector<1x4xf32> -> vector<1x4xf32>
    %17 = vector.extract_strided_slice %5 {offsets = [2, 0], sizes = [1, 4], strides = [1, 1]} : vector<8x4xf32> to vector<1x4xf32>
    %18 = arith.addf %16, %17 : vector<1x4xf32>
    %19 = math.tanh %18 : vector<1x4xf32>
    %cst_11 = arith.constant dense<0.000000e+00> : vector<1x4xf32>
    %20 = tpu.matmul %19, %6, %cst_11 {dimension_numbers = #tpu.dot_dimension_numbers<[1], [0], [0], [1], [0, 0, 1, 1], [], []>} : vector<1x4xf32>, vector<4x4xf32>, vector<1x4xf32> -> vector<1x4xf32>
    %21 = vector.extract_strided_slice %5 {offsets = [3, 0], sizes = [1, 4], strides = [1, 1]} : vector<8x4xf32> to vector<1x4xf32>
    %22 = arith.addf %20, %21 : vector<1x4xf32>
    %23 = math.tanh %22 : vector<1x4xf32>
    %cst_12 = arith.constant dense<0.000000e+00> : vector<1x4xf32>
    %24 = tpu.matmul %23, %6, %cst_12 {dimension_numbers = #tpu.dot_dimension_numbers<[1], [0], [0], [1], [0, 0, 1, 1], [], []>} : vector<1x4xf32>, vector<4x4xf32>, vector<1x4xf32> -> vector<1x4xf32>
    %25 = vector.extract_strided_slice %5 {offsets = [4, 0], sizes = [1, 4], strides = [1, 1]} : vector<8x4xf32> to vector<1x4xf32>
    %26 = arith.addf %24, %25 : vector<1x4xf32>
    %27 = math.tanh %26 : vector<1x4xf32>
    %cst_13 = arith.constant dense<0.000000e+00> : vector<1x4xf32>
    %28 = tpu.matmul %27, %6, %cst_13 {dimension_numbers = #tpu.dot_dimension_numbers<[1], [0], [0], [1], [0, 0, 1, 1], [], []>} : vector<1x4xf32>, vector<4x4xf32>, vector<1x4xf32> -> vector<1x4xf32>
    %29 = vector.extract_strided_slice %5 {offsets = [5, 0], sizes = [1, 4], strides = [1, 1]} : vector<8x4xf32> to vector<1x4xf32>
    %30 = arith.addf %28, %29 : vector<1x4xf32>
    %31 = math.tanh %30 : vector<1x4xf32>
    %cst_14 = arith.constant dense<0.000000e+00> : vector<1x4xf32>
    %32 = tpu.matmul %31, %6, %cst_14 {dimension_numbers = #tpu.dot_dimension_numbers<[1], [0], [0], [1], [0, 0, 1, 1], [], []>} : vector<1x4xf32>, vector<4x4xf32>, vector<1x4xf32> -> vector<1x4xf32>
    %33 = vector.extract_strided_slice %5 {offsets = [6, 0], sizes = [1, 4], strides = [1, 1]} : vector<8x4xf32> to vector<1x4xf32>
    %34 = arith.addf %32, %33 : vector<1x4xf32>
    %35 = math.tanh %34 : vector<1x4xf32>
    %cst_15 = arith.constant dense<0.000000e+00> : vector<1x4xf32>
    %36 = tpu.matmul %35, %6, %cst_15 {dimension_numbers = #tpu.dot_dimension_numbers<[1], [0], [0], [1], [0, 0, 1, 1], [], []>} : vector<1x4xf32>, vector<4x4xf32>, vector<1x4xf32> -> vector<1x4xf32>
    %37 = vector.extract_strided_slice %5 {offsets = [7, 0], sizes = [1, 4], strides = [1, 1]} : vector<8x4xf32> to vector<1x4xf32>
    %38 = arith.addf %36, %37 : vector<1x4xf32>
    %39 = math.tanh %38 : vector<1x4xf32>
    %40 = tpu.concatenate %11, %15, %19, %23, %27, %31, %35, %39 in 0 : vector<1x4xf32>, vector<1x4xf32>, vector<1x4xf32>, vector<1x4xf32>, vector<1x4xf32>, vector<1x4xf32>, vector<1x4xf32>, vector<1x4xf32> -> vector<8x4xf32>
    %c0_16 = arith.constant 0 : index
    %c0_17 = arith.constant 0 : index
    %41 = vector.load %arg4[%c0_16, %c0_17] : memref<8x4xf32, #tpu.memory_space<vmem>>, vector<8x4xf32>
    tpu.vector_store %arg4[%c0_16, %c0_17], %40 {strides = array<i32>} : memref<8x4xf32, #tpu.memory_space<vmem>>, vector<8x4xf32>,
    return
  }
}

</mosaic_0001>

<bundles_post_ra>
// kernel: tpu_custom_call.1
= control target key start
LH: loop header
LB: loop body
LE: loop exit
PB: predicated region body
PF: predicated region fallthrough
CT: control target
= control target key end

     0   :  { %vm30_vm0 = vcmask 1043456   ;;  %vm26_vm1 = vcmask 31744   ;;  %v847_v0 = vmov 0.0   ;;  %vm848_vm2 = vmmov 0   ;;  %s956_s1 = inlined_call_operand.vmem [shape: f32[4,4], index: 1, kind: input, shape index: {}]   ;;  %s957_s0 = inlined_call_operand.vmem [shape: f32[8,4], index: 0, kind: input, shape index: {}]   ;;  %s958_s2 = inlined_call_operand.vmem [shape: f32[4,4], index: 2, kind: input, shape index: {}]   ;;  %s959_s3 = inlined_call_operand.vmem [shape: f32[1,4], index: 3, kind: input, shape index: {}]   ;;  %s960_s4 = inlined_call_operand.vmem [shape: f32[8,4], index: 4, kind: output, shape index: {}]  }
   0x1   :  { %784 = vmatprep.subr.mxu0 %v847_v0  ;;  %v18_v1 = vld [vmem:[%s956_s1] sm:$0xf]  ;;  %786 = vmatprep.mubr.msk.f32.mxu0 %vm848_vm2, %v847_v0  ;;  %vm730_vm3 = vcmask 1040384   ;;  %vm732_vm4 = vcmask 1041408   ;;  %vm734_vm5 = vcmask 1042432   ;;  %vm737_vm6 = vcmask 1044480  }
   0x2   :  { %v17_v2 = vld [vmem:[%s957_s0] sm:$0xff]  ;;  %785 = vmatpush3.msk.msra.mxu0 %vm30_vm0, %v18_v1  ;;  %789 = vmatprep.subr.mxu1 %v847_v0  ;;  %vm739_vm7 = vcmask 1045504   ;;  %vm741_vm8 = vcmask 1046528  }
   0x3   :  { %v886_v3 = vld [vmem:[%s958_s2] sm:$0xf]  ;;  %787 = vmatmul.mubr.msk.f32.vlgmr.msra.gmra.mrb[0].mxu0 %vm26_vm1, %v17_v2  ;;  %791 = vmatprep.mubr.msk.f32.mxu1 %vm848_vm2, %v847_v0 }
   0x4   :  { %790 = vmatpush3.msk.msra.mxu1 %vm30_vm0, %v886_v3  ;;  %794 = vmatprep.subr.mxu0 %v847_v0  ;;  %v748_v4 = vld [vmem:[%s959_s3] ss:$0 sm:$0xff] }
   0x5   :  { %792 = vmatmul.mubr.f32.vlgmr.msra.gmra.mrb[0].mxu1 %v847_v0  ;;  %795 = vmatpush3.msk.msra.mxu0 %vm30_vm0, %v886_v3 }
   0x6   :  { %796 = vmatprep.mubr.msk.f32.mxu0 %vm848_vm2, %v847_v0  ;;  %799 = vmatprep.subr.mxu1 %v847_v0 }
   0x7   :  { %800 = vmatpush3.msk.msra.mxu1 %vm30_vm0, %v886_v3  ;;  %801 = vmatprep.mubr.msk.f32.mxu1 %vm848_vm2, %v847_v0 }
   0x8   :  { %804 = vmatprep.subr.mxu0 %v847_v0  ;;  %809 = vmatprep.subr.mxu1 %v847_v0 }
  0xd6   :  { %v100_v5 = vpop.f32.mrb[0].mxu0 }
  0xd7   :  { %v911_v6 = vadd.f32 %v748_v4, %v100_v5  ;;  %v788_v7 = vpop.f32.mrb[1].mxu0 }
  0xd8   :  { %v177_v8 = vpop.f32.mrb[0].mxu1 }
  0xd9   :  { %v178_v9 = vadd.f32 %v177_v8, %v911_v6  ;;  %v793_v10 = vpop.f32.mrb[1].mxu1  ;;  %v183_v12 = vrot.slane %v911_v6, 1  ;;  %v259_v17 = vrot.slane %v911_v6, 2  ;;  %v335_v26 = vrot.slane %v911_v6, 3 }
  0xda   :  { %v411_v33 = vrot.slane %v911_v6, 4  ;;  %v487_v40 = vrot.slane %v911_v6, 5  ;;  %v563_v47 = vrot.slane %v911_v6, 6  ;;  %v639_v54 = vrot.slane %v911_v6, 7 }
  0xdb   :  { %831 = vtanh.f32 %v178_v9 }
  0xe5   :  { %v832_v11 = vpop.eup %831 }
  0xe6   :  { %797 = vmatmul.mubr.msk.f32.vlgmr.msra.gmra.mrb[2].mxu0 %vm26_vm1, %v832_v11 }
  0xe7   :  { %805 = vmatpush3.msk.msra.mxu0 %vm30_vm0, %v886_v3  ;;  %806 = vmatprep.mubr.msk.f32.mxu0 %vm848_vm2, %v847_v0 }
  0xe8   :  { %814 = vmatprep.subr.mxu0 %v847_v0 }
 0x1b9   :  { %v254_v13 = vpop.f32.mrb[2].mxu0 }
 0x1ba   :  { %v255_v14 = vadd.f32 %v254_v13, %v183_v12  ;;  %v798_v15 = vpop.f32.mrb[3].mxu0 }
 0x1bc   :  { %833 = vtanh.f32 %v255_v14 }
 0x1c6   :  { %v834_v16 = vpop.eup %833 }
 0x1c7   :  { %802 = vmatmul.mubr.msk.f32.vlgmr.msra.gmra.mrb[2].mxu1 %vm26_vm1, %v834_v16  ;;  %v715_v21 = vrot.slane %v834_v16, 7 }
 0x1c8   :  { %810 = vmatpush3.msk.msra.mxu1 %vm30_vm0, %v886_v3  ;;  %811 = vmatprep.mubr.msk.f32.mxu1 %vm848_vm2, %v847_v0 }
 0x1c9   :  { %819 = vmatprep.subr.mxu1 %v847_v0  ;;  %v731_v24 = vsel %vm730_vm3, %v832_v11, %v715_v21 }
 0x29a   :  { %v330_v18 = vpop.f32.mrb[2].mxu1 }
 0x29b   :  { %v331_v19 = vadd.f32 %v330_v18, %v259_v17  ;;  %v803_v20 = vpop.f32.mrb[3].mxu1 }
 0x29d   :  { %835 = vtanh.f32 %v331_v19 }
 0x2a7   :  { %v836_v22 = vpop.eup %835 }
 0x2a8   :  { %v717_v23 = vrot.slane %v836_v22, 6  ;;  %807 = vmatmul.mubr.msk.f32.vlgmr.msra.gmra.mrb[4].mxu0 %vm26_vm1, %v836_v22 }
 0x2a9   :  { %815 = vmatpush3.msk.msra.mxu0 %vm30_vm0, %v886_v3  ;;  %816 = vmatprep.mubr.msk.f32.mxu0 %vm848_vm2, %v847_v0 }
 0x2aa   :  { %v733_v25 = vsel %vm732_vm4, %v731_v24, %v717_v23  ;;  %824 = vmatprep.subr.mxu0 %v847_v0 }
 0x37b   :  { %v406_v27 = vpop.f32.mrb[4].mxu0 }
 0x37c   :  { %v407_v28 = vadd.f32 %v406_v27, %v335_v26  ;;  %v808_v29 = vpop.f32.mrb[5].mxu0 }
 0x37e   :  { %837 = vtanh.f32 %v407_v28 }
 0x388   :  { %v838_v30 = vpop.eup %837 }
 0x389   :  { %v719_v31 = vrot.slane %v838_v30, 5  ;;  %812 = vmatmul.mubr.msk.f32.vlgmr.msra.gmra.mrb[4].mxu1 %vm26_vm1, %v838_v30 }
 0x38a   :  { %820 = vmatpush3.msk.msra.mxu1 %vm30_vm0, %v886_v3  ;;  %821 = vmatprep.mubr.msk.f32.mxu1 %vm848_vm2, %v847_v0 }
 0x38b   :  { %v735_v32 = vsel %vm734_vm5, %v733_v25, %v719_v31 }
 0x45c   :  { %v482_v34 = vpop.f32.mrb[4].mxu1 }
 0x45d   :  { %v483_v35 = vadd.f32 %v482_v34, %v411_v33  ;;  %v813_v36 = vpop.f32.mrb[5].mxu1 }
 0x45f   :  { %839 = vtanh.f32 %v483_v35 }
 0x469   :  { %v840_v37 = vpop.eup %839 }
 0x46a   :  { %v721_v38 = vrot.slane %v840_v37, 4  ;;  %817 = vmatmul.mubr.msk.f32.vlgmr.msra.gmra.mrb[6].mxu0 %vm26_vm1, %v840_v37 }
 0x46b   :  { %825 = vmatpush3.msk.msra.mxu0 %vm30_vm0, %v886_v3  ;;  %826 = vmatprep.mubr.msk.f32.mxu0 %vm848_vm2, %v847_v0 }
 0x46c   :  { %v736_v39 = vsel %vm30_vm0, %v735_v32, %v721_v38 }
 0x53d   :  { %v558_v41 = vpop.f32.mrb[6].mxu0 }
 0x53e   :  { %v559_v42 = vadd.f32 %v558_v41, %v487_v40  ;;  %v818_v43 = vpop.f32.mrb[7].mxu0 }
 0x540   :  { %841 = vtanh.f32 %v559_v42 }
 0x54a   :  { %v842_v44 = vpop.eup %841 }
 0x54b   :  { %v723_v45 = vrot.slane %v842_v44, 3  ;;  %822 = vmatmul.mubr.msk.f32.vlgmr.msra.gmra.mrb[6].mxu1 %vm26_vm1, %v842_v44 }
 0x54d   :  { %v738_v46 = vsel %vm737_vm6, %v736_v39, %v723_v45 }
 0x61e   :  { %v634_v48 = vpop.f32.mrb[6].mxu1 }
 0x61f   :  { %v635_v49 = vadd.f32 %v634_v48, %v563_v47  ;;  %v823_v50 = vpop.f32.mrb[7].mxu1 }
 0x621   :  { %843 = vtanh.f32 %v635_v49 }
 0x62b   :  { %v844_v51 = vpop.eup %843 }
 0x62c   :  { %v725_v52 = vrot.slane %v844_v51, 2  ;;  %827 = vmatmul.mubr.msk.f32.vlgmr.msra.gmra.mrb[8].mxu0 %vm26_vm1, %v844_v51 }
 0x62e   :  { %v740_v53 = vsel %vm739_vm7, %v738_v46, %v725_v52 }
 0x6ff   :  { %v710_v55 = vpop.f32.mrb[8].mxu0 }
 0x700   :  { %v711_v56 = vadd.f32 %v710_v55, %v639_v54  ;;  %v828_v57 = vpop.f32.mrb[9].mxu0 }
 0x702   :  { %845 = vtanh.f32 %v711_v56 }
 0x70c   :  { %v846_v58 = vpop.eup %845 }
 0x70d   :  { %v728_v59 = vrot.slane %v846_v58, 1 }
 0x70f   :  { %v742_v60 = vsel %vm741_vm8, %v740_v53, %v728_v59 }
 0x710   :  { %743 = vst.msk [vmem:[%s960_s4] sm:$0xff] %vm26_vm1, %v742_v60 }

</bundles_post_ra>
